<compile_context>
chip_gen: v6e
topology: v6e:2x2x1
jax: 0.10.0
libtpu: 0.0.40
codegen_flags: <defaults>
</compile_context>

<pallas_src>
import functools

import jax
import jax.numpy as jnp
from jax import lax
from jax.experimental import pallas as pl
from jax.experimental.pallas import tpu as pltpu


def _round_up(x, m):
    return ((x + m - 1) // m) * m


def decoder_kernel(h0_ref, emb_ref, w_blk_ref, b_blk_ref, w_out_ref, b_out_ref,
                   tokens_ref, h_out_ref, widx_sc,
                   *, sos_token, eos_token, bound, unroll_vocab):
    """Greedy GRU decoder, single invocation (no grid).

    h0_ref    : (1, Hp)   f32         initial hidden state (last layer, lane-padded)
    emb_ref   : (V, Ep)   f32         embedding table (lane-padded; f32 keeps the
                                      dynamic single-row read on the unpacked path)
    w_blk_ref : (Ep+Hp, 4*Hp) bf16    fused GRU weights, cols = [r | z | n_in | n_hid]
    b_blk_ref : (1, 4*Hp) f32         fused GRU bias (b_ih+b_hh for r/z, split for n)
    w_out_ref : (C, Hp, VC) bf16      output projection, chunked along vocab
    b_out_ref : (C, 1, VC) f32        output bias (-1e30 on vocab padding)
    tokens_ref: (1, Bp)   i32 out     generated indices, -1 after EOS / padding
    h_out_ref : (1, Hp)   f32 out     final hidden state
    widx_sc   : (1,)      i32 SMEM    vector->scalar handoff for the fed-back index
    """
    Hp = h0_ref.shape[1]
    n_vchunks, _, vchunk = w_out_ref.shape

    # loop-invariant constants hoisted out of the decode loop
    tok_iota = lax.broadcasted_iota(jnp.int32, tokens_ref.shape, 1)   # (1, Bp)
    voc_iota = lax.broadcasted_iota(jnp.int32, (1, vchunk), 1)        # (1, VC)

    x0 = emb_ref[pl.ds(sos_token, 1), :].astype(jnp.bfloat16)  # (1, Ep) SOS embedding
    h0 = h0_ref[...]                                            # (1, Hp) f32
    h0_bf = h0.astype(jnp.bfloat16)
    toks0 = jnp.full(tokens_ref.shape, -1, jnp.int32)

    def cond(carry):
        t, word = carry[0], carry[1]
        return jnp.logical_and(t < bound, word != eos_token)

    def body(carry):
        t, _, x_bf, h, h_bf, toks = carry

        # --- fused GRU cell: one MXU push computes
        #     [W_ir x + W_hr h | W_iz x + W_hz h | W_in x | W_hn h]
        # both halves are already bf16 -> no full-width cast on the critical path
        xh = jnp.concatenate([x_bf, h_bf], axis=1)                       # (1, Ep+Hp) bf16
        g = jnp.dot(xh, w_blk_ref[...],
                    preferred_element_type=jnp.float32) + b_blk_ref[...]
        r = jax.nn.sigmoid(g[:, 0:Hp])
        z = jax.nn.sigmoid(g[:, Hp:2 * Hp])
        n = jnp.tanh(g[:, 2 * Hp:3 * Hp] + r * g[:, 3 * Hp:4 * Hp])
        h_new = (1.0 - z) * n + z * h                                    # (1, Hp) f32
        h_new_bf = h_new.astype(jnp.bfloat16)   # reused for vocab proj AND next GRU step

        # --- chunked vocab projection; per-lane running (best_val, best_idx),
        #     reductions deferred to a single epilogue after the loop
        def vocab_chunk(c, best):
            rv, ri = best
            logits = jnp.dot(h_new_bf, w_out_ref[c],
                             preferred_element_type=jnp.float32) + b_out_ref[c]
            gidx = voc_iota + c * vchunk
            better = logits > rv           # strict '>' keeps the earliest chunk on ties
            return (jnp.where(better, logits, rv),
                    jnp.where(better, gidx, ri))

        run_v0 = jnp.full((1, vchunk), -jnp.inf, jnp.float32)
        run_i0 = jnp.zeros((1, vchunk), jnp.int32)
        run_v, run_i = lax.fori_loop(0, n_vchunks, vocab_chunk,
                                     (run_v0, run_i0), unroll=unroll_vocab)

        # single cross-lane reduction pair (first-occurrence argmax)
        gmax = jnp.max(run_v)
        best_i = jnp.min(jnp.where(run_v == gmax, run_i,
                                   jnp.int32(2 ** 30))).astype(jnp.int32)

        # vector -> scalar handoff through SMEM (known-good lowering path);
        # the token select (pure vector work) is issued between the store and
        # the load so scalar work does not serialize behind it.
        widx_sc[0] = best_i
        # torch breaks before appending EOS -> keep -1 at the EOS position
        tok_val = jnp.where(best_i == eos_token, jnp.int32(-1), best_i)
        toks = jnp.where(tok_iota == t, tok_val, toks)
        idx = widx_sc[0]

        # embedding of the fed-back word for the next step (dropout == identity)
        x_next = emb_ref[pl.ds(idx, 1), :].astype(jnp.bfloat16)
        return t + 1, idx, x_next, h_new, h_new_bf, toks

    init = (jnp.int32(0), jnp.int32(sos_token), x0, h0, h0_bf, toks0)
    _, _, _, h_fin, _, toks_fin = lax.while_loop(cond, body, init)

    tokens_ref[...] = toks_fin
    h_out_ref[...] = h_fin


def pack_decoder_params(params, *, vocab_chunk=1024):
    """Pre-pack PyTorch-shaped parameters into the fused / padded kernel layout.

    Do this once per model; the result is reused across decode calls.
    """
    emb = jnp.asarray(params["embedding"], jnp.float32)      # (V, E)
    w_ih = jnp.asarray(params["w_ih"], jnp.float32)          # (3H, E)
    w_hh = jnp.asarray(params["w_hh"], jnp.float32)          # (3H, H)
    b_ih = jnp.asarray(params["b_ih"], jnp.float32)          # (3H,)
    b_hh = jnp.asarray(params["b_hh"], jnp.float32)          # (3H,)
    w_out = jnp.asarray(params["w_out"], jnp.float32)        # (V, H)
    b_out = jnp.asarray(params["b_out"], jnp.float32)        # (V,)

    V, E = emb.shape
    H = w_hh.shape[1]
    Ep = _round_up(E, 128)
    Hp = _round_up(H, 128)
    Vp128 = _round_up(V, 128)
    VC = min(vocab_chunk, Vp128)
    Vp = _round_up(Vp128, VC)
    n_chunks = Vp // VC

    # embedding, lane-padded; kept f32 so the per-step dynamic row read stays
    # on the unpacked (32-bit) sublane path
    emb_p = jnp.zeros((V, Ep), jnp.float32).at[:, :E].set(emb)

    # fused GRU weight: concat([x, h]) @ w_blk gives, in one MXU push,
    # [ W_ir x + W_hr h | W_iz x + W_hz h | W_in x | W_hn h ]  (each Hp wide)
    w_blk = jnp.zeros((Ep + Hp, 4 * Hp), jnp.float32)
    w_blk = w_blk.at[:E, 0:H].set(w_ih[0:H].T)                    # r, input part
    w_blk = w_blk.at[Ep:Ep + H, 0:H].set(w_hh[0:H].T)             # r, hidden part
    w_blk = w_blk.at[:E, Hp:Hp + H].set(w_ih[H:2 * H].T)          # z, input part
    w_blk = w_blk.at[Ep:Ep + H, Hp:Hp + H].set(w_hh[H:2 * H].T)   # z, hidden part
    w_blk = w_blk.at[:E, 2 * Hp:2 * Hp + H].set(w_ih[2 * H:3 * H].T)         # n_in
    w_blk = w_blk.at[Ep:Ep + H, 3 * Hp:3 * Hp + H].set(w_hh[2 * H:3 * H].T)  # n_hid

    b_blk = jnp.zeros((1, 4 * Hp), jnp.float32)
    b_blk = b_blk.at[0, 0:H].set(b_ih[0:H] + b_hh[0:H])
    b_blk = b_blk.at[0, Hp:Hp + H].set(b_ih[H:2 * H] + b_hh[H:2 * H])
    b_blk = b_blk.at[0, 2 * Hp:2 * Hp + H].set(b_ih[2 * H:3 * H])
    b_blk = b_blk.at[0, 3 * Hp:3 * Hp + H].set(b_hh[2 * H:3 * H])

    # output projection, chunked along vocab; padded logits get a -1e30 bias so
    # the argmax can never pick a padding column (logits stay f32 accumulation)
    w_out_p = jnp.zeros((Hp, Vp), jnp.float32).at[:H, :V].set(w_out.T)
    b_out_p = jnp.full((Vp,), -1e30, jnp.float32).at[:V].set(b_out)
    w_out_c = w_out_p.reshape(Hp, n_chunks, VC).transpose(1, 0, 2)   # (C, Hp, VC)
    b_out_c = b_out_p.reshape(n_chunks, VC)[:, None, :]              # (C, 1, VC)

    return dict(
        emb=emb_p,
        w_blk=w_blk.astype(jnp.bfloat16),
        b_blk=b_blk,
        w_out=w_out_c.astype(jnp.bfloat16),
        b_out=b_out_c,
        dims=dict(V=V, E=E, H=H, Ep=Ep, Hp=Hp, VC=VC, n_chunks=n_chunks),
    )


def _vmem_limit_bytes(resident_bytes):
    """Generation-aware VMEM budget: query physical capacity, keep headroom."""
    try:
        cap = int(pltpu.get_tpu_info().vmem_capacity_bytes)   # 128 MiB v5e/v6e, 64 MiB v7x
    except Exception:
        cap = 64 << 20
    headroom = 8 << 20               # compiler scratch / output buffers
    want = resident_bytes + (8 << 20)
    return int(max(16 << 20, min(want, cap - headroom)))


def decoder_forward(hidden, packed, *, sos_token, eos_token, bound, n_layer=1):
    """hidden: (n_layer_total, 1, hid).

    Returns (tokens, final_hidden) as device arrays:
      tokens       : (bound,) int32, generated indices, -1 after EOS / padding
      final_hidden : (1, hid) float32
    No host sync / Python trimming here (keep the hot path on-device).
    """
    d = packed["dims"]
    H, Hp, n_chunks = d["H"], d["Hp"], d["n_chunks"]
    assert n_layer == 1, "only a single GRU layer is modeled"
    # TODO(synk): n_layer > 1 stacked-GRU recurrence (with inter-layer dropout)
    #             is not modeled.

    h_last = jnp.asarray(hidden, jnp.float32)[-1]                  # (1, H)
    h0 = jnp.zeros((1, Hp), jnp.float32).at[:, :H].set(h_last)

    Bp = _round_up(max(int(bound), 1), 128)

    kernel = functools.partial(
        decoder_kernel,
        sos_token=int(sos_token), eos_token=int(eos_token), bound=int(bound),
        unroll_vocab=max(1, min(4, n_chunks)))

    inputs = (h0, packed["emb"], packed["w_blk"], packed["b_blk"],
              packed["w_out"], packed["b_out"])
    in_bytes = sum(int(a.size) * a.dtype.itemsize for a in inputs)
    out_bytes = Bp * 4 + Hp * 4
    vmem_limit = _vmem_limit_bytes(in_bytes + out_bytes)

    tokens_full, h_fin = pl.pallas_call(
        kernel,
        out_shape=(jax.ShapeDtypeStruct((1, Bp), jnp.int32),
                   jax.ShapeDtypeStruct((1, Hp), jnp.float32)),
        in_specs=[pl.BlockSpec(memory_space=pltpu.MemorySpace.VMEM)] * 6,
        out_specs=(pl.BlockSpec(memory_space=pltpu.MemorySpace.VMEM),
                   pl.BlockSpec(memory_space=pltpu.MemorySpace.VMEM)),
        scratch_shapes=[pltpu.SMEM((1,), jnp.int32)],
        compiler_params=pltpu.CompilerParams(vmem_limit_bytes=vmem_limit),
    )(*inputs)

    return tokens_full[0, :bound], h_fin[:, :H]


def trim_answer(tokens):
    """Host-side helper (outside the hot path): emulate the Python `break`."""
    answer = []
    for v in tokens.tolist():
        if v < 0:
            break
        answer.append(int(v))
    return answer


if __name__ == "__main__":
    # Small synthetic configuration (mirrors Decoder.__init__ shapes)
    VOCAB = 64          # word2vec.lang.n_words
    EMB_DIM = 32        # word2vec.out_dim
    HID_DIM = 32
    N_LAYER = 1
    BOUND = 8
    SOS_TOKEN = 1
    EOS_TOKEN = 2

    key = jax.random.PRNGKey(0)
    ks = jax.random.split(key, 9)
    k = 1.0 / jnp.sqrt(HID_DIM)

    params = {
        "embedding": jax.random.normal(ks[0], (VOCAB, EMB_DIM), jnp.float32),
        # PyTorch GRU parameter shapes: (3H, E), (3H, H), (3H,), (3H,)
        "w_ih": jax.random.uniform(ks[1], (3 * HID_DIM, EMB_DIM), jnp.float32, -k, k),
        "w_hh": jax.random.uniform(ks[2], (3 * HID_DIM, HID_DIM), jnp.float32, -k, k),
        "b_ih": jax.random.uniform(ks[3], (3 * HID_DIM,), jnp.float32, -k, k),
        "b_hh": jax.random.uniform(ks[4], (3 * HID_DIM,), jnp.float32, -k, k),
        # nn.Linear(hid, vocab): weight (V, H), bias (V,)
        "w_out": jax.random.uniform(ks[5], (VOCAB, HID_DIM), jnp.float32, -k, k),
        "b_out": jax.random.uniform(ks[6], (VOCAB,), jnp.float32, -k, k),
    }

    # initial hidden state as produced by an encoder: (n_layer, batch=1, hid)
    hidden = jax.random.normal(ks[7], (N_LAYER, 1, HID_DIM), jnp.float32)

    # TODO(synk): training-mode stochastic dropout on the embedding is not
    #             modeled (identity, as in module.eval()).
    packed = pack_decoder_params(params)
    tokens, h_fin = decoder_forward(
        hidden, packed,
        sos_token=SOS_TOKEN, eos_token=EOS_TOKEN,
        bound=BOUND, n_layer=N_LAYER)

    tokens = jax.block_until_ready(tokens)
    h_fin = jax.block_until_ready(h_fin)
    answer = trim_answer(tokens)

    assert tokens.shape == (BOUND,)
    assert tokens.dtype == jnp.int32
    assert h_fin.shape == (1, HID_DIM)
    assert all(0 <= t < VOCAB for t in answer)

    print("KERNEL_OK")
</pallas_src>

<mosaic_0001>
module attributes {stable_mosaic.version = 11 : i64} {
  func.func @decoder_kernel(%arg0: memref<1x128xf32, #tpu.memory_space<vmem>>, %arg1: memref<64x128xf32, #tpu.memory_space<vmem>>, %arg2: memref<256x512xbf16, #tpu.memory_space<vmem>>, %arg3: memref<1x512xf32, #tpu.memory_space<vmem>>, %arg4: memref<1x128x128xbf16, #tpu.memory_space<vmem>>, %arg5: memref<1x1x128xf32, #tpu.memory_space<vmem>>, %arg6: memref<1x128xi32, #tpu.memory_space<vmem>>, %arg7: memref<1x128xf32, #tpu.memory_space<vmem>>, %arg8: memref<1xi32, #tpu.memory_space<smem>>) attributes {dimension_semantics = [], scalar_prefetch = 0 : i64, scratch_operands = 1 : i64, tpu.core_type = #tpu.core_type<tc>} {
    %0 = tpu.iota {dimensions = array<i32: 1>} : vector<1x128xi32>
    %1 = tpu.iota {dimensions = array<i32: 1>} : vector<1x128xi32>
    %c1 = arith.constant 1 : index
    %c0 = arith.constant 0 : index
    %2 = vector.load %arg1[%c1, %c0] : memref<64x128xf32, #tpu.memory_space<vmem>>, vector<1x128xf32>
    %3 = arith.truncf %2 : vector<1x128xf32> to vector<1x128xbf16>
    %c0_0 = arith.constant 0 : index
    %c0_1 = arith.constant 0 : index
    %4 = vector.load %arg0[%c0_0, %c0_1] : memref<1x128xf32, #tpu.memory_space<vmem>>, vector<1x128xf32>
    %5 = arith.truncf %4 : vector<1x128xf32> to vector<1x128xbf16>
    %c-1_i32 = arith.constant -1 : i32
    %6 = vector.broadcast %c-1_i32 : i32 to vector<1x128xi32>
    %c0_i32 = arith.constant 0 : i32
    %c1_i32 = arith.constant 1 : i32
    %7:6 = scf.while (%arg9 = %c0_i32, %arg10 = %c1_i32, %arg11 = %3, %arg12 = %4, %arg13 = %5, %arg14 = %6) : (i32, i32, vector<1x128xbf16>, vector<1x128xf32>, vector<1x128xbf16>, vector<1x128xi32>) -> (i32, i32, vector<1x128xbf16>, vector<1x128xf32>, vector<1x128xbf16>, vector<1x128xi32>) {
      %c8_i32 = arith.constant 8 : i32
      %10 = arith.cmpi slt, %arg9, %c8_i32 : i32
      %c2_i32 = arith.constant 2 : i32
      %11 = arith.cmpi ne, %arg10, %c2_i32 : i32
      %12 = arith.andi %10, %11 : i1
      scf.condition(%12) %arg9, %arg10, %arg11, %arg12, %arg13, %arg14 : i32, i32, vector<1x128xbf16>, vector<1x128xf32>, vector<1x128xbf16>, vector<1x128xi32>
    } do {
    ^bb0(%arg9: i32, %arg10: i32, %arg11: vector<1x128xbf16>, %arg12: vector<1x128xf32>, %arg13: vector<1x128xbf16>, %arg14: vector<1x128xi32>):
      %10 = tpu.concatenate %arg11, %arg13 in 1 : vector<1x128xbf16>, vector<1x128xbf16> -> vector<1x256xbf16>
      %c0_6 = arith.constant 0 : index
      %c0_7 = arith.constant 0 : index
      %11 = vector.load %arg2[%c0_6, %c0_7] : memref<256x512xbf16, #tpu.memory_space<vmem>>, vector<256x512xbf16>
      %cst = arith.constant dense<0.000000e+00> : vector<1x512xf32>
      %12 = tpu.matmul %10, %11, %cst {dimension_numbers = #tpu.dot_dimension_numbers<[1], [0], [0], [1], [0, 0, 1, 1], [], []>} : vector<1x256xbf16>, vector<256x512xbf16>, vector<1x512xf32> -> vector<1x512xf32>
      %c0_8 = arith.constant 0 : index
      %c0_9 = arith.constant 0 : index
      %13 = vector.load %arg3[%c0_8, %c0_9] : memref<1x512xf32, #tpu.memory_space<vmem>>, vector<1x512xf32>
      %14 = arith.addf %12, %13 : vector<1x512xf32>
      %15 = vector.extract_strided_slice %14 {offsets = [0, 0], sizes = [1, 128], strides = [1, 1]} : vector<1x512xf32> to vector<1x128xf32>
      %16 = arith.negf %15 : vector<1x128xf32>
      %17 = math.exp %16 : vector<1x128xf32>
      %cst_10 = arith.constant 1.000000e+00 : f32
      %18 = vector.broadcast %cst_10 : f32 to vector<1x128xf32>
      %19 = arith.addf %18, %17 : vector<1x128xf32>
      %20 = arith.divf %18, %19 : vector<1x128xf32>
      %21 = vector.extract_strided_slice %14 {offsets = [0, 128], sizes = [1, 128], strides = [1, 1]} : vector<1x512xf32> to vector<1x128xf32>
      %22 = arith.negf %21 : vector<1x128xf32>
      %23 = math.exp %22 : vector<1x128xf32>
      %cst_11 = arith.constant 1.000000e+00 : f32
      %24 = vector.broadcast %cst_11 : f32 to vector<1x128xf32>
      %25 = arith.addf %24, %23 : vector<1x128xf32>
      %26 = arith.divf %24, %25 : vector<1x128xf32>
      %27 = vector.extract_strided_slice %14 {offsets = [0, 256], sizes = [1, 128], strides = [1, 1]} : vector<1x512xf32> to vector<1x128xf32>
      %28 = vector.extract_strided_slice %14 {offsets = [0, 384], sizes = [1, 128], strides = [1, 1]} : vector<1x512xf32> to vector<1x128xf32>
      %29 = arith.mulf %20, %28 : vector<1x128xf32>
      %30 = arith.addf %27, %29 : vector<1x128xf32>
      %31 = math.tanh %30 : vector<1x128xf32>
      %cst_12 = arith.constant 1.000000e+00 : f32
      %32 = vector.broadcast %cst_12 : f32 to vector<1x128xf32>
      %33 = arith.subf %32, %26 : vector<1x128xf32>
      %34 = arith.mulf %33, %31 : vector<1x128xf32>
      %35 = arith.mulf %26, %arg12 : vector<1x128xf32>
      %36 = arith.addf %34, %35 : vector<1x128xf32>
      %37 = arith.truncf %36 : vector<1x128xf32> to vector<1x128xbf16>
      %cst_13 = arith.constant 0xFF800000 : f32
      %38 = vector.broadcast %cst_13 : f32 to vector<1x128xf32>
      %c0_i32_14 = arith.constant 0 : i32
      %39 = vector.broadcast %c0_i32_14 : i32 to vector<1x128xi32>
      %c0_i32_15 = arith.constant 0 : i32
      %40 = arith.index_cast %c0_i32_15 : i32 to index
      %c0_16 = arith.constant 0 : index
      %c0_17 = arith.constant 0 : index
      %41 = vector.load %arg4[%40, %c0_16, %c0_17] : memref<1x128x128xbf16, #tpu.memory_space<vmem>>, vector<1x128x128xbf16>
      %42 = vector.shape_cast %41 : vector<1x128x128xbf16> to vector<128x128xbf16>
      %cst_18 = arith.constant dense<0.000000e+00> : vector<1x128xf32>
      %43 = tpu.matmul %37, %42, %cst_18 {dimension_numbers = #tpu.dot_dimension_numbers<[1], [0], [0], [1], [0, 0, 1, 1], [], []>} : vector<1x128xbf16>, vector<128x128xbf16>, vector<1x128xf32> -> vector<1x128xf32>
      %44 = arith.index_cast %c0_i32_15 : i32 to index
      %c0_19 = arith.constant 0 : index
      %c0_20 = arith.constant 0 : index
      %45 = vector.load %arg5[%44, %c0_19, %c0_20] : memref<1x1x128xf32, #tpu.memory_space<vmem>>, vector<1x1x128xf32>
      %46 = vector.shape_cast %45 : vector<1x1x128xf32> to vector<1x128xf32>
      %47 = arith.addf %43, %46 : vector<1x128xf32>
      %c128_i32 = arith.constant 128 : i32
      %48 = arith.muli %c0_i32_15, %c128_i32 : i32
      %49 = vector.broadcast %48 : i32 to vector<1x128xi32>
      %50 = arith.addi %1, %49 : vector<1x128xi32>
      %51 = arith.cmpf ogt, %47, %38 : vector<1x128xf32>
      %52 = arith.select %51, %47, %38 : vector<1x128xi1>, vector<1x128xf32>
      %53 = arith.select %51, %50, %39 : vector<1x128xi1>, vector<1x128xi32>
      %c1_i32_21 = arith.constant 1 : i32
      %54 = vector.shape_cast %52 : vector<1x128xf32> to vector<1x1x128xf32>
      %cst_22 = arith.constant dense<0xFF800000> : vector<1xf32>
      %55 = vector.multi_reduction <maximumf>, %54, %cst_22 [1, 2] : vector<1x1x128xf32> to vector<1xf32>
      %56 = vector.shape_cast %55 : vector<1xf32> to vector<1x1x1xf32>
      %57 = vector.extract %56[0, 0, 0] : f32 from vector<1x1x1xf32>
      %58 = vector.broadcast %57 : f32 to vector<1x128xf32>
      %59 = arith.cmpf oeq, %52, %58 : vector<1x128xf32>
      %c1073741824_i32 = arith.constant 1073741824 : i32
      %60 = vector.broadcast %c1073741824_i32 : i32 to vector<1x128xi32>
      %61 = arith.select %59, %53, %60 : vector<1x128xi1>, vector<1x128xi32>
      %62 = vector.shape_cast %61 : vector<1x128xi32> to vector<1x1x128xi32>
      %cst_23 = arith.constant dense<2147483647> : vector<1xi32>
      %63 = vector.multi_reduction <minsi>, %62, %cst_23 [1, 2] : vector<1x1x128xi32> to vector<1xi32>
      %64 = vector.shape_cast %63 : vector<1xi32> to vector<1x1x1xi32>
      %65 = vector.extract %64[0, 0, 0] : i32 from vector<1x1x1xi32>
      %c0_24 = arith.constant 0 : index
      %66 = memref.load %arg8[%c0_24] : memref<1xi32, #tpu.memory_space<smem>>
      memref.store %65, %arg8[%c0_24] : memref<1xi32, #tpu.memory_space<smem>>
      %c2_i32 = arith.constant 2 : i32
      %67 = arith.cmpi eq, %65, %c2_i32 : i32
      %c-1_i32_25 = arith.constant -1 : i32
      %68 = arith.select %67, %c-1_i32_25, %65 : i32
      %69 = vector.broadcast %arg9 : i32 to vector<1x128xi32>
      %70 = arith.cmpi eq, %0, %69 : vector<1x128xi32>
      %71 = vector.broadcast %68 : i32 to vector<1x128xi32>
      %72 = arith.select %70, %71, %arg14 : vector<1x128xi1>, vector<1x128xi32>
      %c0_26 = arith.constant 0 : index
      %73 = memref.load %arg8[%c0_26] : memref<1xi32, #tpu.memory_space<smem>>
      %74 = arith.index_cast %73 : i32 to index
      %c0_27 = arith.constant 0 : index
      %75 = vector.load %arg1[%74, %c0_27] : memref<64x128xf32, #tpu.memory_space<vmem>>, vector<1x128xf32>
      %76 = arith.truncf %75 : vector<1x128xf32> to vector<1x128xbf16>
      %c1_i32_28 = arith.constant 1 : i32
      %77 = arith.addi %arg9, %c1_i32_28 : i32
      scf.yield %77, %73, %76, %36, %37, %72 : i32, i32, vector<1x128xbf16>, vector<1x128xf32>, vector<1x128xbf16>, vector<1x128xi32>
    }
    %c0_2 = arith.constant 0 : index
    %c0_3 = arith.constant 0 : index
    %8 = vector.load %arg6[%c0_2, %c0_3] : memref<1x128xi32, #tpu.memory_space<vmem>>, vector<1x128xi32>
    tpu.vector_store %arg6[%c0_2, %c0_3], %7#5 {strides = array<i32>} : memref<1x128xi32, #tpu.memory_space<vmem>>, vector<1x128xi32>,
    %c0_4 = arith.constant 0 : index
    %c0_5 = arith.constant 0 : index
    %9 = vector.load %arg7[%c0_4, %c0_5] : memref<1x128xf32, #tpu.memory_space<vmem>>, vector<1x128xf32>
    tpu.vector_store %arg7[%c0_4, %c0_5], %7#3 {strides = array<i32>} : memref<1x128xf32, #tpu.memory_space<vmem>>, vector<1x128xf32>,
    return
  }
}

</mosaic_0001>

<bundles_post_ra>
// kernel: tpu_custom_call.1
= control target key start
LH: loop header
LB: loop body
LE: loop exit
PB: predicated region body
PF: predicated region fallthrough
CT: control target
= control target key end

     0   :  { %13 = vsyncpa [#allocation4], 0  ;;  %s1408_s0 = inlined_call_operand.hbm [shape: f32[1,128], index: 0, kind: input, shape index: {}]   ;;  %s1409_s1 = inlined_call_operand.hbm [shape: f32[64,128], index: 1, kind: input, shape index: {}]   ;;  %s1410_s2 = inlined_call_operand.hbm [shape: bf16[256,512], index: 2, kind: input, shape index: {}]   ;;  %s1411_s3 = inlined_call_operand.vmem [shape: f32[1,512], index: 3, kind: input, shape index: {}]   ;;  %s1412_s4 = inlined_call_operand.hbm [shape: bf16[1,128,128], index: 4, kind: input, shape index: {}]   ;;  %s1413_s5 = inlined_call_operand.vmem [shape: f32[1,1,128], index: 5, kind: input, shape index: {}]   ;;  %s1414_s6 = inlined_call_operand.hbm [shape: s32[1,128], index: 6, kind: output, shape index: {0}]   ;;  %s1415_s7 = inlined_call_operand.hbm [shape: f32[1,128], index: 7, kind: output, shape index: {1}]  }
   0x1   :  { %14 = vsyncpa [#allocation7], 0 }
   0x2   :  { %15 = vsyncpa [#allocation10], 0 }
   0x3   :  { %16 = vsyncpa [#allocation5], 0 }
   0x4   :  { %17 = vsyncpa [#allocation13], 0  ;;  %s1267_s24 = smov [#allocation6]  }
   0x5   :  { %s33_s25 = sshll.u32 %s1267_s24, 4  ;;  %s34_s25 = int_to_ptr.vmem [resolvable:$true] %s33_s25 }
   0x6   :  { %s1105_s26 = scalar_lea.vmem %s34_s25, 1024  ;;  %p1110_p1 = scmp.lt.s32.totalorder %s34_s25, %s34_s25 }
   0x7   :  { %p1106_p0 = scmp.ne.s32.totalorder %s34_s25, %s1105_s26  ;;  %p1111_p2 = scmp.lt.s32.totalorder %s1105_s26, %s1105_s26 }
   0x9   :  { %p1112_p3 = por %p1111_p2, %p1110_p1 }
   0xb   :  { %p1113_p4 = pnand %p1112_p3, %p1106_p0 }
   0xd   :  { %1116 = shalt.err (!%p1113_p4)
}
   0xe   :  { %s1268_s27 = smov 128   ;;  %s1269_s28 = smov 8  }
   0xf   :  { %39 = dma.hbm_to_vmem [thread:$0]  %s1409_s1, 1024, %s34_s25, [#allocation7], %s1268_s27, %s1268_s27, %s1269_s28  }
  0x10   :  { %s1270_s8 = smov [#allocation3]   ;;  %s1271_s10 = smov [#allocation8]  }
  0x11   :  { %s24_s9 = sshll.u32 %s1270_s8, 4  ;;  %s45_s11 = sshll.u32 %s1271_s10, 4  ;;  %s25_s9 = int_to_ptr.vmem [resolvable:$true] %s24_s9  ;;  %s46_s11 = int_to_ptr.vmem [resolvable:$true] %s45_s11 }
  0x12   :  { %s1125_s12 = scalar_lea.vmem %s25_s9, 16  ;;  %s1129_s13 = scalar_lea.vmem %s25_s9, 32 }
  0x13   :  { %p1126_p5 = scmp.ne.s32.totalorder %s25_s9, %s1125_s12  ;;  %p1130_p6 = scmp.lt.s32.totalorder %s25_s9, %s25_s9 }
  0x14   :  { %p1131_p7 = scmp.lt.s32.totalorder %s1129_s13, %s1125_s12 }
  0x16   :  { %p1132_p8 = por %p1131_p7, %p1130_p6 }
  0x18   :  { %p1133_p9 = pnand %p1132_p8, %p1126_p5 }
  0x1a   :  { %1136 = shalt.err (!%p1133_p9)
}
  0x1b   :  { %27 = dma.hbm_to_vmem [thread:$0]  %s1408_s0, 16, %s25_s9, [#allocation4]  }
  0x1c   :  { %s1145_s16 = scalar_lea.vmem %s46_s11, 8192  ;;  %p1150_p11 = scmp.lt.s32.totalorder %s46_s11, %s46_s11 }
  0x1d   :  { %p1146_p10 = scmp.ne.s32.totalorder %s46_s11, %s1145_s16  ;;  %p1151_p12 = scmp.lt.s32.totalorder %s1145_s16, %s1145_s16 }
  0x1f   :  { %p1152_p13 = por %p1151_p12, %p1150_p11 }
  0x21   :  { %p1153_p0 = pnand %p1152_p13, %p1146_p10 }
  0x23   :  { %1156 = shalt.err (!%p1153_p0)
}
  0x24   :  { %s1272_s1 = smov 256   ;;  %s1273_s17 = smov 16  }
  0x25   :  { %51 = dma.hbm_to_vmem [thread:$0]  %s1410_s2, 8192, %s46_s11, [#allocation7], %s1272_s1, %s1272_s1, %s1273_s17  }
  0x26   :  { %s1274_s20 = smov [#allocation9]  }
  0x27   :  { %s59_s21 = sshll.u32 %s1274_s20, 4  ;;  %s60_s21 = int_to_ptr.vmem [resolvable:$true] %s59_s21 }
  0x28   :  { %s1165_s22 = scalar_lea.vmem %s60_s21, 1024  ;;  %p1170_p2 = scmp.lt.s32.totalorder %s60_s21, %s60_s21 }
  0x29   :  { %p1166_p1 = scmp.ne.s32.totalorder %s60_s21, %s1165_s22  ;;  %p1171_p3 = scmp.lt.s32.totalorder %s1165_s22, %s1165_s22 }
  0x2b   :  { %p1172_p4 = por %p1171_p3, %p1170_p2 }
  0x2d   :  { %p1173_p5 = pnand %p1172_p4, %p1166_p1 }
  0x2f   :  { %1176 = shalt.err (!%p1173_p5)
}
  0x30   :  { %s1275_s0 = smov 64   ;;  %s1276_s23 = smov 4  }
  0x31   :  { %65 = dma.hbm_to_vmem [thread:$0]  %s1412_s4, 1024, %s60_s21, [#allocation10], %s1275_s0, %s1275_s0, %s1276_s23  }
  0x32   :  { %1237 = dma.done.wait [#allocation4], 16  }
  0x33   :  { %1238 = vsyncadd [#allocation4], 4294967280 }
  0x34   :  { %1239 = dma.done.wait [#allocation7], 9216  }
  0x35   :  { %1240 = vsyncadd [#allocation7], 4294958080 }
  0x36   :  { %1241 = dma.done.wait [#allocation10], 1024  }
  0x37   :  { %1242 = vsyncadd [#allocation10], 4294966272  ;;  %v81_v0 = vlaneseq  ;;  %v83_v2 = vld [vmem:[#allocation6 + $0x1] sm:$0x1]  ;;  %v85_v3 = vld [vmem:[#allocation3] sm:$0x1]  }
  0x38   :  { %v84_v4 = vpack.c.bf16 %v83_v2, %v83_v2   ;;  %v86_v5 = vpack.c.bf16 %v85_v3, %v85_v3   ;;  %v1336_v6 = vmov 4294967295   ;;  %s1344_s2 = smov 0  }
  0x39   :  { %v1334_v1 = vand.u32 127, %v81_v0 }
  0x3a LB: > { %v983_v7 = vld [vmem:[#allocation8 + $0xe4] ss:$16 sps:$4 sm:$0xff]   ;;  %v985_v8 = vld [vmem:[#allocation8 + $0xe0] ss:$16 sps:$4 sm:$0xff]   ;;  %538 = vmatprep.mubr.bf16.mxu0 %v1253_v5  ;;  %579 = vmatprep.mubr.bf16.mxu1 %v1253_v5  ;;  %v1003_v14 = vld [vmem:[#allocation8 + $0xec] ss:$16 sps:$4 sm:$0xff]   ;;  %s1265_s2 = sphi %s1344_s2, %s1419_s2   ;;  %v1261_v4 = vphi %v84_v4, %v766_v4   ;;  %v1257_v3 = vphi %v85_v3, %v1418_v3   ;;  %v1253_v5 = vphi %v86_v5, %v1370_v5   ;;  %v1249_v6 = vphi %v1336_v6, %v1417_v6  }
  0x3b   : > { %506 = vmatprep.subr.bf16.mxu0 %v983_v7  ;;  %v986_v9 = vld [vmem:[#allocation8 + $0xc4] ss:$16 sps:$4 sm:$0xff]   ;;  %v988_v10 = vld [vmem:[#allocation8 + $0xc0] ss:$16 sps:$4 sm:$0xff]   ;;  %v1006_v15 = vld [vmem:[#allocation8 + $0xe8] ss:$16 sps:$4 sm:$0xff]   ;;  %547 = vmatprep.subr.bf16.mxu1 %v1003_v14 }
  0x3c   : > { %507 = vmatpush1.bf16.msra.mxu0 %v985_v8  ;;  %v989_v11 = vld [vmem:[#allocation8 + $0xa4] ss:$16 sps:$4 sm:$0xff]   ;;  %v991_v12 = vld [vmem:[#allocation8 + $0xa0] ss:$16 sps:$4 sm:$0xff]   ;;  %548 = vmatpush1.bf16.msra.mxu1 %v1006_v15  ;;  %v1009_v18 = vld [vmem:[#allocation8 + $0xcc] ss:$16 sps:$4 sm:$0xff]  }
  0x3d   : > { %508 = vmatprep.subr.bf16.mxu0 %v986_v9  ;;  %v992_v13 = vld [vmem:[#allocation8 + $0x84] ss:$16 sps:$4 sm:$0xff]   ;;  %v994_v16 = vld [vmem:[#allocation8 + $0x80] ss:$16 sps:$4 sm:$0xff]   ;;  %v1012_v19 = vld [vmem:[#allocation8 + $0xc8] ss:$16 sps:$4 sm:$0xff]   ;;  %549 = vmatprep.subr.bf16.mxu1 %v1009_v18 }
  0x3e   : > { %v995_v17 = vld [vmem:[#allocation8 + $0x64] ss:$16 sps:$4 sm:$0xff]   ;;  %v997_v20 = vld [vmem:[#allocation8 + $0x60] ss:$16 sps:$4 sm:$0xff]   ;;  %v1015_v22 = vld [vmem:[#allocation8 + $0xac] ss:$16 sps:$4 sm:$0xff]  }
  0x3f   : > { %v998_v21 = vld [vmem:[#allocation8 + $0x44] ss:$16 sps:$4 sm:$0xff]   ;;  %v1018_v23 = vld [vmem:[#allocation8 + $0xa8] ss:$16 sps:$4 sm:$0xff]   ;;  %v1021_v24 = vld [vmem:[#allocation8 + $0x8c] ss:$16 sps:$4 sm:$0xff]  }
  0x40   : > { %509 = vmatpush1.bf16.msra.mxu0 %v988_v10  ;;  %550 = vmatpush1.bf16.msra.mxu1 %v1012_v19  ;;  %v1000_v25 = vld [vmem:[#allocation8 + $0x40] ss:$16 sps:$4 sm:$0xff]   ;;  %v1001_v26 = vld [vmem:[#allocation8 + $0x24] ss:$16 sps:$4 sm:$0xff]   ;;  %v1024_v27 = vld [vmem:[#allocation8 + $0x88] ss:$16 sps:$4 sm:$0xff]  }
  0x41   : > { %510 = vmatprep.subr.bf16.mxu0 %v989_v11  ;;  %551 = vmatprep.subr.bf16.mxu1 %v1015_v22  ;;  %v1027_v28 = vld [vmem:[#allocation8 + $0x6c] ss:$16 sps:$4 sm:$0xff]   ;;  %v1005_v29 = vld [vmem:[#allocation8 + $0x20] ss:$16 sps:$4 sm:$0xff]   ;;  %v1007_v30 = vld [vmem:[#allocation8 + $0x4] ss:$16 sps:$4 sm:$0xff]  }
  0x42   : > { %v1030_v31 = vld [vmem:[#allocation8 + $0x68] ss:$16 sps:$4 sm:$0xff]   ;;  %v1033_v32 = vld [vmem:[#allocation8 + $0x4c] ss:$16 sps:$4 sm:$0xff]   ;;  %v1011_v33 = vld [vmem:[#allocation8] ss:$16 sps:$4 sm:$0xff]  }
  0x43   : > { %v1013_v34 = vld [vmem:[#allocation8 + $0x1e4] ss:$16 sps:$4 sm:$0xff]   ;;  %v1036_v35 = vld [vmem:[#allocation8 + $0x48] ss:$16 sps:$4 sm:$0xff]   ;;  %v1039_v36 = vld [vmem:[#allocation8 + $0x2c] ss:$16 sps:$4 sm:$0xff]  }
  0x44   : > { %511 = vmatpush1.bf16.msra.mxu0 %v991_v12  ;;  %552 = vmatpush1.bf16.msra.mxu1 %v1018_v23  ;;  %v1017_v37 = vld [vmem:[#allocation8 + $0x1e0] ss:$16 sps:$4 sm:$0xff]   ;;  %v1019_v38 = vld [vmem:[#allocation8 + $0x1c4] ss:$16 sps:$4 sm:$0xff]   ;;  %v1042_v39 = vld [vmem:[#allocation8 + $0x28] ss:$16 sps:$4 sm:$0xff]  }
  0x45   : > { %512 = vmatprep.subr.bf16.mxu0 %v992_v13  ;;  %553 = vmatprep.subr.bf16.mxu1 %v1021_v24  ;;  %v1045_v40 = vld [vmem:[#allocation8 + $0xc] ss:$16 sps:$4 sm:$0xff]   ;;  %v1023_v41 = vld [vmem:[#allocation8 + $0x1c0] ss:$16 sps:$4 sm:$0xff]   ;;  %v1025_v42 = vld [vmem:[#allocation8 + $0x1a4] ss:$16 sps:$4 sm:$0xff]  }
  0x46   : > { %v1048_v43 = vld [vmem:[#allocation8 + $0x8] ss:$16 sps:$4 sm:$0xff]   ;;  %v1051_v44 = vld [vmem:[#allocation8 + $0x1ec] ss:$16 sps:$4 sm:$0xff]   ;;  %v1029_v45 = vld [vmem:[#allocation8 + $0x1a0] ss:$16 sps:$4 sm:$0xff]  }
  0x47   : > { %v1031_v46 = vld [vmem:[#allocation8 + $0x184] ss:$16 sps:$4 sm:$0xff]   ;;  %v1054_v47 = vld [vmem:[#allocation8 + $0x1e8] ss:$16 sps:$4 sm:$0xff]   ;;  %v1057_v48 = vld [vmem:[#allocation8 + $0x1cc] ss:$16 sps:$4 sm:$0xff]  }
  0x48   : > { %513 = vmatpush1.bf16.msra.mxu0 %v994_v16  ;;  %554 = vmatpush1.bf16.msra.mxu1 %v1024_v27  ;;  %v1035_v49 = vld [vmem:[#allocation8 + $0x180] ss:$16 sps:$4 sm:$0xff]   ;;  %v1037_v50 = vld [vmem:[#allocation8 + $0x164] ss:$16 sps:$4 sm:$0xff]   ;;  %v1060_v51 = vld [vmem:[#allocation8 + $0x1c8] ss:$16 sps:$4 sm:$0xff]  }
  0x49   : > { %514 = vmatprep.subr.bf16.mxu0 %v995_v17  ;;  %555 = vmatprep.subr.bf16.mxu1 %v1027_v28  ;;  %v1061_v52 = vld [vmem:[#allocation8 + $0x1ac] ss:$16 sps:$4 sm:$0xff]   ;;  %v1041_v53 = vld [vmem:[#allocation8 + $0x160] ss:$16 sps:$4 sm:$0xff]   ;;  %v1043_v54 = vld [vmem:[#allocation8 + $0x144] ss:$16 sps:$4 sm:$0xff]  }
  0x4a   : > { %v1063_v55 = vld [vmem:[#allocation8 + $0x1a8] ss:$16 sps:$4 sm:$0xff]   ;;  %v1064_v56 = vld [vmem:[#allocation8 + $0x18c] ss:$16 sps:$4 sm:$0xff]   ;;  %v1047_v57 = vld [vmem:[#allocation8 + $0x140] ss:$16 sps:$4 sm:$0xff]  }
  0x4b   : > { %v1049_v58 = vld [vmem:[#allocation8 + $0x124] ss:$16 sps:$4 sm:$0xff]   ;;  %v1066_v59 = vld [vmem:[#allocation8 + $0x188] ss:$16 sps:$4 sm:$0xff]   ;;  %v1067_v60 = vld [vmem:[#allocation8 + $0x16c] ss:$16 sps:$4 sm:$0xff]  }
  0x4c   : > { %515 = vmatpush1.bf16.msra.mxu0 %v997_v20  ;;  %556 = vmatpush1.bf16.msra.mxu1 %v1030_v31  ;;  %v1053_v61 = vld [vmem:[#allocation8 + $0x120] ss:$16 sps:$4 sm:$0xff]   ;;  %v1055_v62 = vld [vmem:[#allocation8 + $0x104] ss:$16 sps:$4 sm:$0xff]   ;;  %v1069_v63 = vld [vmem:[#allocation8 + $0x168] ss:$16 sps:$4 sm:$0xff]  }
  0x4d   : > { %516 = vmatprep.subr.bf16.mxu0 %v998_v21  ;;  %557 = vmatprep.subr.bf16.mxu1 %v1033_v32  ;;  %v1070_v2 = vld [vmem:[#allocation8 + $0x14c] ss:$16 sps:$4 sm:$0xff]   ;;  %v1059_v5 = vld [vmem:[#allocation8 + $0x100] ss:$16 sps:$4 sm:$0xff]   ;;  %v1072_v7 = vld [vmem:[#allocation8 + $0x148] ss:$16 sps:$4 sm:$0xff]  }
  0x4e   : > { %v1073_v8 = vld [vmem:[#allocation8 + $0x12c] ss:$16 sps:$4 sm:$0xff]   ;;  %v1075_v9 = vld [vmem:[#allocation8 + $0x128] ss:$16 sps:$4 sm:$0xff]   ;;  %v1277_v13 = vmov 0.0   ;;  %v1080_v14 = vld [vmem:[#allocation9 + $0x30] sm:$0xff]  }
  0x4f   : > { %v1076_v10 = vld [vmem:[#allocation8 + $0x10c] ss:$16 sps:$4 sm:$0xff]   ;;  %v1078_v11 = vld [vmem:[#allocation8 + $0x108] ss:$16 sps:$4 sm:$0xff]   ;;  %v1082_v16 = vld [vmem:[#allocation9 + $0x20] sm:$0xff]   ;;  %vm1278_vm0 = vmmov 0  }
  0x50   : > { %517 = vmatpush1.bf16.msra.mxu0 %v1000_v25  ;;  %558 = vmatpush1.bf16.msra.mxu1 %v1036_v35  ;;  %v1079_v12 = vld [vmem:[#allocation9 + $0x38] sm:$0xff]   ;;  %v1081_v15 = vld [vmem:[#allocation9 + $0x28] sm:$0xff]   ;;  %v1084_v18 = vld [vmem:[#allocation9 + $0x10] sm:$0xff]   ;;  %v487_v20 = vshrl.u32 %v81_v0, 7  ;;  %vm716_vm1 = vcmask 1040384   ;;  %s767_s30 = sadd.s32 1, %s1265_s2  }
  0x51   : > { %518 = vmatprep.subr.bf16.mxu0 %v1001_v26  ;;  %559 = vmatprep.subr.bf16.mxu1 %v1039_v36  ;;  %v1083_v17 = vld [vmem:[#allocation9 + $0x18] sm:$0xff]   ;;  %v1086_v19 = vld [vmem:[#allocation9] sm:$0xff]   ;;  %p94_p7 = scmp.lt.s32.totalorder %s767_s30, 8 }
  0x52   : > { %v488_v21 = vsub.s32 0, %v487_v20  ;;  %v164_v22 = vld [vmem:[%s1411_s3] sm:$0xf]  ;;  %v492_v24 = vsub.s32 1, %v487_v20 }
  0x54   : > { %519 = vmatpush1.bf16.msra.mxu0 %v1005_v29  ;;  %560 = vmatpush1.bf16.msra.mxu1 %v1042_v39  ;;  %v489_v23 = vrot.slane %v164_v22, %v488_v21  ;;  %v493_v29 = vrot.slane %v164_v22, %v492_v24 }
  0x55   : > { %520 = vmatprep.subr.bf16.mxu0 %v1007_v30  ;;  %561 = vmatprep.subr.bf16.mxu1 %v1045_v40  ;;  %v500_v40 = vsub.s32 3, %v487_v20 }
  0x58   : > { %521 = vmatpush1.bf16.msra.mxu0 %v1011_v33  ;;  %562 = vmatpush1.bf16.msra.mxu1 %v1048_v43  ;;  %v501_v43 = vrot.slane %v164_v22, %v500_v40 }
  0x59   : > { %522 = vmatprep.subr.bf16.mxu0 %v1013_v34  ;;  %563 = vmatprep.subr.bf16.mxu1 %v1051_v44 }
  0x5c   : > { %523 = vmatpush2.bf16.msra.mxu0 %v1017_v37  ;;  %564 = vmatpush2.bf16.msra.mxu1 %v1054_v47 }
  0x5d   : > { %524 = vmatprep.subr.bf16.mxu0 %v1019_v38  ;;  %565 = vmatprep.subr.bf16.mxu1 %v1057_v48 }
  0x60   : > { %525 = vmatpush2.bf16.msra.mxu0 %v1023_v41  ;;  %566 = vmatpush2.bf16.msra.mxu1 %v1060_v51  ;;  %v496_v41 = vsub.s32 2, %v487_v20 }
  0x61   : > { %526 = vmatprep.subr.bf16.mxu0 %v1025_v42  ;;  %567 = vmatprep.subr.bf16.mxu1 %v1061_v52 }
  0x64   : > { %527 = vmatpush2.bf16.msra.mxu0 %v1029_v45  ;;  %568 = vmatpush2.bf16.msra.mxu1 %v1063_v55  ;;  %v497_v45 = vrot.slane %v164_v22, %v496_v41 }
  0x65   : > { %528 = vmatprep.subr.bf16.mxu0 %v1031_v46  ;;  %569 = vmatprep.subr.bf16.mxu1 %v1064_v56 }
  0x68   : > { %529 = vmatpush2.bf16.msra.mxu0 %v1035_v49  ;;  %570 = vmatpush2.bf16.msra.mxu1 %v1066_v59 }
  0x69   : > { %530 = vmatprep.subr.bf16.mxu0 %v1037_v50  ;;  %571 = vmatprep.subr.bf16.mxu1 %v1067_v60 }
  0x6c   : > { %531 = vmatpush2.bf16.msra.mxu0 %v1041_v53  ;;  %572 = vmatpush2.bf16.msra.mxu1 %v1069_v63 }
  0x6d   : > { %532 = vmatprep.subr.bf16.mxu0 %v1043_v54  ;;  %573 = vmatprep.subr.bf16.mxu1 %v1070_v2 }
  0x70   : > { %533 = vmatpush2.bf16.msra.mxu0 %v1047_v57  ;;  %574 = vmatpush2.bf16.msra.mxu1 %v1072_v7  ;;  %v624_v57 = vld [vmem:[%s1413_s5] sm:$0x1] }
  0x71   : > { %534 = vmatprep.subr.bf16.mxu0 %v1049_v58  ;;  %575 = vmatprep.subr.bf16.mxu1 %v1073_v8 }
  0x74   : > { %535 = vmatpush2.bf16.msra.mxu0 %v1053_v61  ;;  %576 = vmatpush2.bf16.msra.mxu1 %v1075_v9 }
  0x75   : > { %536 = vmatprep.subr.bf16.mxu0 %v1055_v62  ;;  %577 = vmatprep.subr.bf16.mxu1 %v1076_v10 }
  0x78   : > { %537 = vmatpush2.bf16.msra.mxu0 %v1059_v5  ;;  %578 = vmatpush2.bf16.msra.mxu1 %v1078_v11 }
  0x79   : > { %905 = vmatprep.subr.bf16.mxu0 %v1277_v13 }
  0x7b   : > { %539 = vmatmul.mubr.bf16.vlgmr.msra.gmra.mxu0 %v1261_v4  ;;  %580 = vmatmul.mubr.bf16.vlgmr.msra.gmra.mxu1 %v1261_v4  ;;  %v1085_v4 = vld [vmem:[#allocation9 + $0x8] sm:$0xff]  }
  0x7c   : > { %906 = vmatpush3.bf16.msra.mxu0 %v1079_v12  ;;  %921 = vmatprep.mubr.msk.bf16.mxu0 %vm1278_vm0, %v1277_v13 }
  0x7d   : > { %907 = vmatprep.subr.bf16.mxu0 %v1277_v13 }
  0x80   : > { %908 = vmatpush3.bf16.msra.mxu0 %v1080_v14 }
  0x81   : > { %909 = vmatprep.subr.bf16.mxu0 %v1277_v13 }
  0x84   : > { %910 = vmatpush3.bf16.msra.mxu0 %v1081_v15 }
  0x85   : > { %911 = vmatprep.subr.bf16.mxu0 %v1277_v13 }
  0x88   : > { %912 = vmatpush3.bf16.msra.mxu0 %v1082_v16 }
  0x89   : > { %913 = vmatprep.subr.bf16.mxu0 %v1277_v13 }
  0x8c   : > { %914 = vmatpush3.bf16.msra.mxu0 %v1083_v17 }
  0x8d   : > { %915 = vmatprep.subr.bf16.mxu0 %v1277_v13 }
  0x90   : > { %916 = vmatpush3.bf16.msra.mxu0 %v1084_v18 }
  0x91   : > { %917 = vmatprep.subr.bf16.mxu0 %v1277_v13 }
  0x94   : > { %918 = vmatpush3.bf16.msra.mxu0 %v1085_v4 }
  0x95   : > { %919 = vmatprep.subr.bf16.mxu0 %v1277_v13 }
  0x98   : > { %920 = vmatpush3.bf16.msra.mxu0 %v1086_v19 }
 0x13b   : > { %v540_v25 = vpop.f32.mrf.mxu0  ;;  %v581_v33 = vpop.f32.mrf.mxu1 }
 0x13c   : > { %v541_v26 = vadd.f32 %v540_v25, %v489_v23  ;;  %v582_v48 = vadd.f32 %v581_v33, %v497_v45  ;;  %v759_v33 = vstv %s1265_s2  ;;  %s1419_s2 = smov %s767_s30 }
 0x13d   : > { %v542_v27 = vpop.f32.mrf.mxu0  ;;  %v583_v35 = vpop.f32.mrf.mxu1  ;;  %vm760_vm8 = vcmp.eq.s32.totalorder %v1334_v1, %v759_v33 }
 0x13e   : > { %v886_v28 = vmul.f32 -1.442695, %v541_v26  ;;  %v543_v32 = vadd.f32 %v542_v27, %v493_v29  ;;  %v584_v46 = vadd.f32 %v583_v35, %v501_v43 }
 0x13f   : > { %v544_v30 = vpop.f32.mrf.mxu0  ;;  %v585_v36 = vpop.f32.mrf.mxu1 }
 0x140   : > { %1087 = vpow2.f32 %v886_v28  ;;  %v887_v34 = vmul.f32 -1.442695, %v543_v32 }
 0x141   : > { %v545_v31 = vpop.f32.mrf.mxu0  ;;  %v586_v37 = vpop.f32.mrf.mxu1 }
 0x142   : > { %1089 = vpow2.f32 %v887_v34 }
 0x14d   : > { %v1088_v38 = vpop.eup %1087 }
 0x14e   : > { %v591_v39 = vadd.f32 1.0, %v1088_v38 }
 0x14f   : > { %v1090_v42 = vpop.eup %1089 }
 0x150   : > { %1091 = vrcp.f32 %v591_v39  ;;  %v597_v44 = vadd.f32 1.0, %v1090_v42 }
 0x152   : > { %1093 = vrcp.f32 %v597_v44 }
 0x15d   : > { %v1092_v47 = vpop.eup %1091 }
 0x15e   : > { %v600_v49 = vmul.f32 %v1092_v47, %v584_v46 }
 0x15f   : > { %v1094_v51 = vpop.eup %1093 }
 0x160   : > { %v601_v50 = vadd.f32 %v600_v49, %v582_v48  ;;  %v603_v52 = vsub.f32 1.0, %v1094_v51  ;;  %v605_v55 = vmul.f32 %v1257_v3, %v1094_v51 }
 0x162   : > { %1095 = vtanh.f32 %v601_v50 }
 0x16f   : > { %v1096_v53 = vpop.eup %1095 }
 0x170   : > { %v604_v54 = vmul.f32 %v1096_v53, %v603_v52 }
 0x172   : > { %v1366_v3 = vadd.f32 %v605_v55, %v604_v54  }
 0x174   : > { %v1416_v56 = vmov %v1366_v3 }
 0x175   : > { %v1370_v5 = vpack.c.bf16 %v1416_v56, %v1416_v56  }
 0x177   : > { %922 = vmatmul.mubr.bf16.vlgmr.msra.gmra.mxu0 %v1370_v5 }
 0x237   : > { %v707_v58 = vpop.f32.mrf.mxu0 }
 0x238   : > { %v708_v59 = vadd.f32 %v707_v58, %v624_v57 }
 0x239   : > { %v923_v60 = vpop.f32.mrf.mxu0 }
 0x23a   : > { %vm713_vm2 = vcmp.gt.f32.partialorder %v708_v59, -inf }
 0x23b   : > { %v710_v61 = vpop.f32.mrf.mxu0  ;;  %v714_v62 = vsel %vm713_vm2, %v708_v59, -inf  ;;  %v715_v14 = vsel %vm713_vm2, %v1334_v1, 0 }
 0x23c   : > { %v717_v3 = vsel %vm716_vm1, %v714_v62, -inf }
 0x23d   : > { %718 = vmax.xlane.f32.xlu0 %v717_v3  ;;  %v924_v63 = vpop.f32.mrf.mxu0  ;;  %v1418_v3 = vmov %v1416_v56 }
 0x2c6   : > { %v719_v2 = vpop.xlane.xlu0 %718 }
 0x2c7   : > { %v720_v7 = vrot.slane %v719_v2, 4 }
 0x2c9   : > { %v721_v8 = vmax.f32 %v719_v2, %v720_v7 }
 0x2cb   : > { %v722_v9 = vrot.slane %v721_v8, 2 }
 0x2cd   : > { %v723_v10 = vmax.f32 %v721_v8, %v722_v9 }
 0x2cf   : > { %v724_v11 = vrot.slane %v723_v10, 1 }
 0x2d1   : > { %v725_v12 = vmax.f32 %v723_v10, %v724_v11 }
 0x2d3   : > { %925 = vpush %v725_v12 }
 0x304   : > { %s926_s29 = spop %925 }
 0x305   : > { %v727_v13 = vstv %s926_s29 }
 0x306   : > { %vm728_vm3 = vcmp.eq.f32.partialorder %v714_v62, %v727_v13 }
 0x307   : > { %v729_v15 = vsel %vm728_vm3, %v715_v14, 1073741824 }
 0x308   : > { %v730_v16 = vsel %vm716_vm1, %v729_v15, 2147483647 }
 0x309   : > { %v732_v17 = vshra.s32 %v730_v16, 16  ;;  %v731_v4 = vand.u32 65535, %v730_v16 }
 0x30b   : > { %v734_v18 = vcvt.s32.f32 %v732_v17  ;;  %v733_v20 = vcvt.s32.f32 %v731_v4 }
 0x30d   : > { %735 = vmin.xlane.f32.xlu0 %v734_v18 }
 0x396   : > { %v736_v19 = vpop.xlane.xlu0 %735 }
 0x397   : > { %vm737_vm4 = vcmp.eq.f32.partialorder %v734_v18, %v736_v19  ;;  %v742_v22 = vcvt.f32.s32 %v736_v19 }
 0x398   : > { %v738_v21 = vsel %vm737_vm4, %v733_v20, inf }
 0x399   : > { %739 = vmin.xlane.f32.xlu1 %v738_v21  ;;  %v743_v24 = vshll.u32 %v742_v22, 16 }
 0x422   : > { %v740_v23 = vpop.xlane.xlu1 %739 }
 0x423   : > { %v741_v25 = vcvt.f32.s32 %v740_v23 }
 0x425   : > { %v744_v26 = vadd.s32 %v743_v24, %v741_v25 }
 0x427   : > { %v745_v27 = vrot.slane %v744_v26, 4 }
 0x429   : > { %vm746_vm5 = vcmp.lt.s32.totalorder %v744_v26, %v745_v27 }
 0x42a   : > { %v747_v28 = vsel %vm746_vm5, %v744_v26, %v745_v27 }
 0x42b   : > { %v748_v29 = vrot.slane %v747_v28, 2 }
 0x42d   : > { %vm749_vm6 = vcmp.lt.s32.totalorder %v747_v28, %v748_v29 }
 0x42e   : > { %v750_v30 = vsel %vm749_vm6, %v747_v28, %v748_v29 }
 0x42f   : > { %v751_v31 = vrot.slane %v750_v30, 1 }
 0x431   : > { %vm752_vm7 = vcmp.lt.s32.totalorder %v750_v30, %v751_v31 }
 0x432   : > { %v753_v32 = vsel %vm752_vm7, %v750_v30, %v751_v31 }
 0x433   : > { %927 = vpush %v753_v32 }
 0x464   : > { %s928_s8 = spop %927 }
 0x465   : > { %p757_p6 = scmp.eq.s32.totalorder %s928_s8, 2  ;;  %s764_s9 = scalar_lea.vmem [#allocation6], %s928_s8 }
 0x466   : > { %v765_v34 = vld [vmem:[%s764_s9] sm:$0x1]  ;;  %p95_p8 = scmp.ne.s32.totalorder %s928_s8, 2 }
 0x467   : > { %s758_s10 = scalar_select %p757_p6, 4294967295, %s928_s8  ;;  %v766_v4 = vpack.c.bf16 %v765_v34, %v765_v34  }
 0x468   : > { %p96_p9 = pnand %p95_p8, %p94_p7 }
 0x469   : > { %v761_v35 = vstv %s758_s10  ;;  %769 = vst [vmem:[#allocation12] sm:$0x1] (%p96_p9), %v1416_v56  ;;  %s1279_s11 = smov (%p96_p9), [#allocation11]   ;;  %s1280_s13 = smov (%p96_p9), [#allocation12]  }
 0x46a   : > { %v762_v36 = vsel %vm760_vm8, %v761_v35, %v1249_v6   ;;  %99 = sbr.rel (!%p96_p9) target bundleno = 58 (0x3a), region = 77  ;;  %s776_s12 = sshll.u32 (%p96_p9), %s1279_s11, 4  ;;  %s777_s12 = int_to_ptr.vmem [resolvable:$true] %s776_s12 }
 0x46b   : > { %v1417_v6 = vmov %v762_v36  ;;  %768 = vst [vmem:[#allocation11] sm:$0x1] (%p96_p9), %v762_v36  ;;  %s786_s14 = sshll.u32 (%p96_p9), %s1280_s13, 4  ;;  %s1177_s15 = scalar_lea.vmem (%p96_p9), %s777_s12, 16  ;;  %s787_s14 = int_to_ptr.vmem [resolvable:$true] %s786_s14 }
 0x46c   :  { %p1178_p10 = scmp.ne.s32.totalorder (%p96_p9), %s777_s12, %s1177_s15  ;;  %s1181_s16 = scalar_lea.vmem (%p96_p9), %s777_s12, 32 }
 0x46d   :  { %p1182_p11 = scmp.lt.s32.totalorder (%p96_p9), %s777_s12, %s777_s12  ;;  %p1183_p12 = scmp.lt.s32.totalorder (%p96_p9), %s1181_s16, %s1177_s15 }
 0x46f   :  { %p1184_p13 = por %p1183_p12, %p1182_p11 }
 0x471   :  { %p1185_p0 = pnand %p1184_p13, %p1178_p10 }
 0x473   :  { %1188 = shalt.err (!%p1185_p0)
}
 0x474   :  { %779 = dma.vmem_to_hbm [thread:$0]  %s777_s12, 16, %s1414_s6, [#allocation5]  }
 0x475   :  { %s1197_s3 = scalar_lea.vmem %s787_s14, 16  ;;  %s1201_s5 = scalar_lea.vmem %s787_s14, 32 }
 0x476   :  { %p1198_p1 = scmp.ne.s32.totalorder %s787_s14, %s1197_s3  ;;  %p1202_p2 = scmp.lt.s32.totalorder %s787_s14, %s787_s14 }
 0x477   :  { %p1203_p3 = scmp.lt.s32.totalorder %s1201_s5, %s1197_s3 }
 0x479   :  { %p1204_p4 = por %p1203_p3, %p1202_p2 }
 0x47b   :  { %p1205_p5 = pnand %p1204_p4, %p1198_p1 }
 0x47d   :  { %1208 = shalt.err (!%p1205_p5)
}
 0x47e   :  { %789 = dma.vmem_to_hbm [thread:$0]  %s787_s14, 16, %s1415_s7, [#allocation13]  }
 0x47f   :  { %1243 = dma.done.wait [#allocation5], 16  }
 0x480   :  { %1244 = vsyncadd [#allocation5], 4294967280 }
 0x481   :  { %1245 = dma.done.wait [#allocation13], 16  }
 0x482   :  { %1246 = vsyncadd [#allocation13], 4294967280 }
 0x483   :  { %796 = vsyncpa [#allocation4], 1 }
 0x484   :  { %797 = vsyncpa [#allocation7], 1 }
 0x485   :  { %798 = vsyncpa [#allocation10], 1 }
 0x486   :  { %799 = vsyncpa [#allocation5], 1 }
 0x487   :  { %800 = vsyncpa [#allocation13], 1 }

</bundles_post_ra>
